<compile_context>
chip_gen: v6e
topology: v6e:2x2x1
jax: 0.10.0
libtpu: 0.0.40
codegen_flags: <defaults>
</compile_context>

<pallas_src>
import functools

import jax
import jax.numpy as jnp
from jax.experimental import pallas as pl
from jax.experimental.pallas import tpu as pltpu


def _round_up(n, m):
    return (n + m - 1) // m * m


def _critic_kernel(cfg, state_ref, act_ref, w_ref, b_ref, out_ref, x_scr):
    """Fused MLP critic.  All parameters come packed in two slabs:
       w_ref: (Kmax_p, sum Np_i) compute-dtype weights, b_ref: (1, sum Np_i) f32."""
    F, A, Fp = cfg["F"], cfg["A"], cfg["Fp"]
    FAp, H1p = cfg["FAp"], cfg["H1p"]
    cdtype = cfg["compute_dtype"]
    B = state_ref.shape[0]

    # ---- In-kernel activation prep (replaces per-call XLA concat/pad/cast). ----
    # Zero the lane-aligned scratch, then scatter state -> lanes [0:F] and
    # actions -> lanes [Fp:Fp+A].  Both stores start on a 128-lane tile boundary.
    x_scr[...] = jnp.zeros_like(x_scr)
    x_scr[0:B, 0:F] = state_ref[...]
    x_scr[0:B, Fp:Fp + A] = act_ref[...]

    # ---- Layer 1: single fused matmul over [state | actions]. ----
    # bf16 MXU operands, f32 accumulation; bias add + ReLU in f32 on the VPU.
    x = x_scr[...].astype(cdtype)
    h = jnp.dot(x, w_ref[0:FAp, 0:H1p], preferred_element_type=jnp.float32)
    h = jnp.maximum(h + b_ref[0:1, 0:H1p], 0.0)

    # ---- Hidden layers + output layer (statically unrolled from the slab). ----
    for (kp, np_, off, is_last) in cfg["layers"]:
        h = jnp.dot(h.astype(cdtype), w_ref[0:kp, off:off + np_],
                    preferred_element_type=jnp.float32)
        h = h + b_ref[0:1, off:off + np_]
        if not is_last:
            h = jnp.maximum(h, 0.0)

    # Unpadded output directly from the kernel (no post-kernel slice op).
    out_ref[...] = h[0:B, 0:cfg["n_out"]]


def prepare_critic_params(w1s, b1s, w1a, b1a, hidden_params, w_out, b_out,
                          compute_dtype=jnp.bfloat16):
    """One-time packing (hoisted out of the per-call path).

    Weights arrive in PyTorch layout: W (out, in), b (out,).
    Returns (w_slab, b_slab, cfg):
      w_slab: (Kmax_p, H1p + sum Hip + Op) compute_dtype, chunks along lanes:
              chunk 0 = fused layer-1 weight with w1s^T in rows [0:F] and
              w1a^T in rows [Fp:Fp+A]; subsequent chunks = hidden / out W^T.
      b_slab: (1, same width) f32, chunk 0 = b1s + b1a, then per-layer biases.
      cfg:    static layout metadata consumed by the kernel.
    """
    F, A, H1 = w1s.shape[1], w1a.shape[1], w1s.shape[0]
    Fp, Ap = _round_up(F, 128), _round_up(A, 128)
    FAp = Fp + Ap
    H1p = _round_up(H1, 128)

    # Chunk 0: fused layer-1 weight + combined bias.
    w1_blk = jnp.zeros((FAp, H1p), jnp.float32)
    w1_blk = w1_blk.at[0:F, 0:H1].set(w1s.T)
    w1_blk = w1_blk.at[Fp:Fp + A, 0:H1].set(w1a.T)
    b1_blk = jnp.zeros((1, H1p), jnp.float32).at[0, 0:H1].set(b1s + b1a)

    w_blocks, b_blocks = [w1_blk], [b1_blk]
    layers = []                       # (K_pad, N_pad, lane_offset, is_last)
    col_off, prev, prev_p = H1p, H1, H1p
    all_layers = list(hidden_params) + [(w_out, b_out)]
    for idx, (w, b) in enumerate(all_layers):
        n = w.shape[0]
        np_ = _round_up(n, 128)
        w_blocks.append(jnp.zeros((prev_p, np_), jnp.float32).at[0:prev, 0:n].set(w.T))
        b_blocks.append(jnp.zeros((1, np_), jnp.float32).at[0, 0:n].set(b))
        layers.append((prev_p, np_, col_off, idx == len(all_layers) - 1))
        col_off += np_
        prev, prev_p = n, np_

    kmax = max(blk.shape[0] for blk in w_blocks)
    w_slab = jnp.concatenate(
        [jnp.pad(blk, ((0, kmax - blk.shape[0]), (0, 0))) for blk in w_blocks],
        axis=1).astype(compute_dtype)
    b_slab = jnp.concatenate(b_blocks, axis=1)      # stays f32

    dot_kn = FAp * H1p + sum(kp * np_ for (kp, np_, _, _) in layers)
    cfg = {
        "F": F, "A": A, "Fp": Fp, "FAp": FAp, "H1p": H1p,
        "layers": tuple(layers), "n_out": w_out.shape[0],
        "compute_dtype": compute_dtype, "dot_kn": dot_kn,
    }
    return w_slab, b_slab, cfg


def ddpg_critic_forward(state, actions, w_slab, b_slab, cfg):
    """state: (B, F) f32, actions: (B, A) f32.  Zero per-call JAX-side array ops:
    everything (pad/cast/scatter/slice) happens inside the single pallas_call.
    For best amortization stack multiple independent critic evaluations along B."""
    B = state.shape[0]
    Bp = _round_up(B, 16)    # safe for both f32 (8-row) and bf16 (16-row) tiling

    flops = 2 * Bp * cfg["dot_kn"]
    bytes_accessed = int(
        state.size * 4 + actions.size * 4
        + w_slab.size * w_slab.dtype.itemsize + b_slab.size * 4
        + B * cfg["n_out"] * 4
    )

    kernel = functools.partial(_critic_kernel, cfg)
    return pl.pallas_call(
        kernel,
        out_shape=jax.ShapeDtypeStruct((B, cfg["n_out"]), jnp.float32),
        in_specs=[pl.BlockSpec(memory_space=pltpu.MemorySpace.VMEM)] * 4,
        out_specs=pl.BlockSpec(memory_space=pltpu.MemorySpace.VMEM),
        scratch_shapes=[pltpu.VMEM((Bp, cfg["FAp"]), jnp.float32)],
        cost_estimate=pl.CostEstimate(flops=flops, transcendentals=0,
                                      bytes_accessed=bytes_accessed),
    )(state, actions, w_slab, b_slab)


def _linear_init(key, out_f, in_f, w_bounds=None):
    """Deterministic init mimicking nn.Linear defaults (uniform +-1/sqrt(in))."""
    kw, kb = jax.random.split(key)
    bound = 1.0 / (in_f ** 0.5)
    if w_bounds is None:
        w = jax.random.uniform(kw, (out_f, in_f), jnp.float32, -bound, bound)
    else:
        w = jax.random.uniform(kw, (out_f, in_f), jnp.float32, w_bounds[0], w_bounds[1])
    b = jax.random.uniform(kb, (out_f,), jnp.float32, -bound, bound)
    return w, b


def _reference_forward(state, actions, w1s, b1s, w1a, b1a, hidden_params, w_out, b_out):
    out = state @ w1s.T + b1s + actions @ w1a.T + b1a
    out = jnp.maximum(out, 0.0)
    for (w, b) in hidden_params:
        out = jnp.maximum(out @ w.T + b, 0.0)
    return out @ w_out.T + b_out


if __name__ == "__main__":
    # Module hyper-params (defaults + one optional hidden layer features_hidden_2)
    number_input_features = 11
    number_actions = 1
    features_hidden_1 = 32
    features_hidden_2 = 32
    init_bounds = (-0.0003, 0.0003)
    batch = 8

    key = jax.random.PRNGKey(0)
    ks = jax.random.split(key, 6)

    # Parameters (deterministic, PyTorch Linear layout: W (out, in), b (out,))
    w1s, b1s = _linear_init(ks[0], features_hidden_1, number_input_features)
    w1a, b1a = _linear_init(ks[1], features_hidden_1, number_actions)
    w2, b2 = _linear_init(ks[2], features_hidden_2, features_hidden_1)
    w_out, b_out = _linear_init(
        ks[3], number_actions, features_hidden_2, w_bounds=init_bounds
    )
    hidden_params = [(w2, b2)]

    # One-time parameter packing (transpose + pad + bf16 cast + slab concat).
    w_slab, b_slab, cfg = prepare_critic_params(
        w1s, b1s, w1a, b1a, hidden_params, w_out, b_out
    )
    w_slab, b_slab = jax.block_until_ready(w_slab), jax.block_until_ready(b_slab)

    # Inputs: x = (state, actions)
    state = jax.random.normal(ks[4], (batch, number_input_features), jnp.float32)
    actions = jax.random.normal(ks[5], (batch, number_actions), jnp.float32)

    logits = ddpg_critic_forward(state, actions, w_slab, b_slab, cfg)
    logits = jax.block_until_ready(logits)

    ref = _reference_forward(
        state, actions, w1s, b1s, w1a, b1a, hidden_params, w_out, b_out
    )
    assert logits.shape == (batch, number_actions)
    # bf16 MXU operands -> loosened tolerance vs. f32 reference.
    assert jnp.allclose(logits, ref, atol=2e-2, rtol=2e-2), (
        jnp.max(jnp.abs(logits - ref))
    )

    print("KERNEL_OK")
</pallas_src>

<mosaic_0001>
module attributes {stable_mosaic.version = 11 : i64} {
  func.func @_critic_kernel(%arg0: memref<8x11xf32, #tpu.memory_space<vmem>>, %arg1: memref<8x1xf32, #tpu.memory_space<vmem>>, %arg2: memref<256x384xbf16, #tpu.memory_space<vmem>>, %arg3: memref<1x384xf32, #tpu.memory_space<vmem>>, %arg4: memref<8x1xf32, #tpu.memory_space<vmem>>, %arg5: memref<16x256xf32, #tpu.memory_space<vmem>>) attributes {dimension_semantics = [], scalar_prefetch = 0 : i64, scratch_operands = 1 : i64, tpu.core_type = #tpu.core_type<tc>} {
    %cst = arith.constant 0.000000e+00 : f32
    %0 = vector.broadcast %cst : f32 to vector<16x256xf32>
    %c0 = arith.constant 0 : index
    %c0_0 = arith.constant 0 : index
    %1 = vector.load %arg5[%c0, %c0_0] : memref<16x256xf32, #tpu.memory_space<vmem>>, vector<16x256xf32>
    tpu.vector_store %arg5[%c0, %c0_0], %0 {strides = array<i32>} : memref<16x256xf32, #tpu.memory_space<vmem>>, vector<16x256xf32>,
    %c0_1 = arith.constant 0 : index
    %c0_2 = arith.constant 0 : index
    %2 = vector.load %arg0[%c0_1, %c0_2] : memref<8x11xf32, #tpu.memory_space<vmem>>, vector<8x11xf32>
    %c0_3 = arith.constant 0 : index
    %c0_4 = arith.constant 0 : index
    %3 = vector.load %arg5[%c0_3, %c0_4] : memref<16x256xf32, #tpu.memory_space<vmem>>, vector<8x11xf32>
    tpu.vector_store %arg5[%c0_3, %c0_4], %2 {strides = array<i32>} : memref<16x256xf32, #tpu.memory_space<vmem>>, vector<8x11xf32>,
    %c0_5 = arith.constant 0 : index
    %c0_6 = arith.constant 0 : index
    %4 = vector.load %arg1[%c0_5, %c0_6] : memref<8x1xf32, #tpu.memory_space<vmem>>, vector<8x1xf32>
    %c0_7 = arith.constant 0 : index
    %c128 = arith.constant 128 : index
    %5 = vector.load %arg5[%c0_7, %c128] : memref<16x256xf32, #tpu.memory_space<vmem>>, vector<8x1xf32>
    tpu.vector_store %arg5[%c0_7, %c128], %4 {strides = array<i32>} : memref<16x256xf32, #tpu.memory_space<vmem>>, vector<8x1xf32>,
    %c0_8 = arith.constant 0 : index
    %c0_9 = arith.constant 0 : index
    %6 = vector.load %arg5[%c0_8, %c0_9] : memref<16x256xf32, #tpu.memory_space<vmem>>, vector<16x256xf32>
    %7 = arith.truncf %6 : vector<16x256xf32> to vector<16x256xbf16>
    %c0_10 = arith.constant 0 : index
    %c0_11 = arith.constant 0 : index
    %8 = vector.load %arg2[%c0_10, %c0_11] : memref<256x384xbf16, #tpu.memory_space<vmem>>, vector<256x128xbf16>
    %cst_12 = arith.constant dense<0.000000e+00> : vector<16x128xf32>
    %9 = tpu.matmul %7, %8, %cst_12 {dimension_numbers = #tpu.dot_dimension_numbers<[1], [0], [0], [1], [0, 0, 1, 1], [], []>} : vector<16x256xbf16>, vector<256x128xbf16>, vector<16x128xf32> -> vector<16x128xf32>
    %c0_13 = arith.constant 0 : index
    %c0_14 = arith.constant 0 : index
    %10 = vector.load %arg3[%c0_13, %c0_14] : memref<1x384xf32, #tpu.memory_space<vmem>>, vector<1x128xf32>
    %11 = vector.broadcast %10 : vector<1x128xf32> to vector<16x128xf32>
    %12 = arith.addf %9, %11 : vector<16x128xf32>
    %cst_15 = arith.constant 0.000000e+00 : f32
    %13 = vector.broadcast %cst_15 : f32 to vector<16x128xf32>
    %14 = arith.maximumf %12, %13 : vector<16x128xf32>
    %15 = arith.truncf %14 : vector<16x128xf32> to vector<16x128xbf16>
    %c0_16 = arith.constant 0 : index
    %c128_17 = arith.constant 128 : index
    %16 = vector.load %arg2[%c0_16, %c128_17] : memref<256x384xbf16, #tpu.memory_space<vmem>>, vector<128x128xbf16>
    %cst_18 = arith.constant dense<0.000000e+00> : vector<16x128xf32>
    %17 = tpu.matmul %15, %16, %cst_18 {dimension_numbers = #tpu.dot_dimension_numbers<[1], [0], [0], [1], [0, 0, 1, 1], [], []>} : vector<16x128xbf16>, vector<128x128xbf16>, vector<16x128xf32> -> vector<16x128xf32>
    %c0_19 = arith.constant 0 : index
    %c128_20 = arith.constant 128 : index
    %18 = vector.load %arg3[%c0_19, %c128_20] : memref<1x384xf32, #tpu.memory_space<vmem>>, vector<1x128xf32>
    %19 = vector.broadcast %18 : vector<1x128xf32> to vector<16x128xf32>
    %20 = arith.addf %17, %19 : vector<16x128xf32>
    %cst_21 = arith.constant 0.000000e+00 : f32
    %21 = vector.broadcast %cst_21 : f32 to vector<16x128xf32>
    %22 = arith.maximumf %20, %21 : vector<16x128xf32>
    %23 = arith.truncf %22 : vector<16x128xf32> to vector<16x128xbf16>
    %c0_22 = arith.constant 0 : index
    %c256 = arith.constant 256 : index
    %24 = vector.load %arg2[%c0_22, %c256] : memref<256x384xbf16, #tpu.memory_space<vmem>>, vector<128x128xbf16>
    %cst_23 = arith.constant dense<0.000000e+00> : vector<16x128xf32>
    %25 = tpu.matmul %23, %24, %cst_23 {dimension_numbers = #tpu.dot_dimension_numbers<[1], [0], [0], [1], [0, 0, 1, 1], [], []>} : vector<16x128xbf16>, vector<128x128xbf16>, vector<16x128xf32> -> vector<16x128xf32>
    %c0_24 = arith.constant 0 : index
    %c256_25 = arith.constant 256 : index
    %26 = vector.load %arg3[%c0_24, %c256_25] : memref<1x384xf32, #tpu.memory_space<vmem>>, vector<1x128xf32>
    %27 = vector.broadcast %26 : vector<1x128xf32> to vector<16x128xf32>
    %28 = arith.addf %25, %27 : vector<16x128xf32>
    %29 = vector.extract_strided_slice %28 {offsets = [0, 0], sizes = [8, 1], strides = [1, 1]} : vector<16x128xf32> to vector<8x1xf32>
    %c0_26 = arith.constant 0 : index
    %c0_27 = arith.constant 0 : index
    %30 = vector.load %arg4[%c0_26, %c0_27] : memref<8x1xf32, #tpu.memory_space<vmem>>, vector<8x1xf32>
    tpu.vector_store %arg4[%c0_26, %c0_27], %29 {strides = array<i32>} : memref<8x1xf32, #tpu.memory_space<vmem>>, vector<8x1xf32>,
    return
  }
}

</mosaic_0001>

<bundles_post_ra>
// kernel: tpu_custom_call.1
= control target key start
LH: loop header
LB: loop body
LE: loop exit
PB: predicated region body
PF: predicated region fallthrough
CT: control target
= control target key end

     0   :  { %9 = vsyncpa [#allocation4], 0  ;;  %s633_s15 = smov [#allocation3]   ;;  %s708_s0 = inlined_call_operand.vmem [shape: f32[8,11], index: 0, kind: input, shape index: {}]   ;;  %s709_s1 = inlined_call_operand.vmem [shape: f32[8,1], index: 1, kind: input, shape index: {}]   ;;  %s710_s2 = inlined_call_operand.hbm [shape: bf16[256,384], index: 2, kind: input, shape index: {}]   ;;  %s711_s3 = inlined_call_operand.vmem [shape: f32[1,384], index: 3, kind: input, shape index: {}]   ;;  %s712_s4 = inlined_call_operand.vmem [shape: f32[8,1], index: 4, kind: output, shape index: {}]  }
   0x1   :  { %s19_s16 = sshll.u32 %s633_s15, 4  ;;  %s20_s16 = int_to_ptr.vmem [resolvable:$true] %s19_s16 }
   0x2   :  { %s619_s17 = scalar_lea.vmem %s20_s16, 6144  ;;  %p624_p1 = scmp.lt.s32.totalorder %s20_s16, %s20_s16 }
   0x3   :  { %p620_p0 = scmp.ne.s32.totalorder %s20_s16, %s619_s17  ;;  %p625_p2 = scmp.lt.s32.totalorder %s619_s17, %s619_s17 }
   0x5   :  { %p626_p3 = por %p625_p2, %p624_p1 }
   0x7   :  { %p627_p4 = pnand %p626_p3, %p620_p0 }
   0x9   :  { %630 = shalt.err (!%p627_p4)
}
   0xa   :  { %s634_s18 = smov 192   ;;  %s635_s19 = smov 12  }
   0xb   :  { %25 = dma.hbm_to_vmem [thread:$0]  %s710_s2, 6144, %s20_s16, [#allocation4], %s634_s18, %s634_s18, %s635_s19  }
   0xc   :  { %631 = dma.done.wait [#allocation4], 6144  }
   0xd   :  { %632 = vsyncadd [#allocation4], 4294961152  ;;  %v636_v0 = vmov 0.0   ;;  %v579_v1 = vld [vmem:[#allocation3 + $0x168] ss:$12 sps:$4 sm:$0xff]   ;;  %vm40_vm0 = vcmask 7168  }
   0xe   :  { %33 = vst [vmem:[#allocation2 + $0x8] sm:$0xff] %v636_v0  ;;  %32 = vst [vmem:[#allocation2] sm:$0xff] %v636_v0  ;;  %534 = vmatprep.subr.bf16.mxu1 %v636_v0  ;;  %v580_v2 = vld [vmem:[#allocation3 + $0xa8] ss:$12 sps:$4 sm:$0xff]   ;;  %494 = vmatprep.subr.bf16.mxu0 %v579_v1  ;;  %v581_v3 = vld [vmem:[#allocation3 + $0x150] ss:$12 sps:$4 sm:$0xff]  }
   0xf   :  { %495 = vmatpush3.bf16.msra.mxu0 %v580_v2  ;;  %v582_v4 = vld [vmem:[#allocation3 + $0x90] ss:$12 sps:$4 sm:$0xff]   ;;  %v583_v5 = vld [vmem:[#allocation3 + $0x138] ss:$12 sps:$4 sm:$0xff]   ;;  %v585_v7 = vld [vmem:[#allocation3 + $0x120] ss:$12 sps:$4 sm:$0xff]  }
  0x10   :  { %496 = vmatprep.subr.bf16.mxu0 %v581_v3  ;;  %v584_v6 = vld [vmem:[#allocation3 + $0x78] ss:$12 sps:$4 sm:$0xff]   ;;  %v586_v8 = vld [vmem:[#allocation3 + $0x60] ss:$12 sps:$4 sm:$0xff]   ;;  %v587_v9 = vld [vmem:[#allocation3 + $0x108] ss:$12 sps:$4 sm:$0xff]  }
  0x11   :  { %vm37_vm1 = vcmask 89088   ;;  %v588_v10 = vld [vmem:[#allocation3 + $0x48] ss:$12 sps:$4 sm:$0xff]   ;;  %v589_v11 = vld [vmem:[#allocation3 + $0xf0] ss:$12 sps:$4 sm:$0xff]   ;;  %v39_v12 = vld [vmem:[%s709_s1] sm:$0xff] }
  0x12   :  { %v36_v13 = vld [vmem:[%s708_s0] sm:$0xff]  ;;  %41 = vst.msk [vmem:[#allocation2 + $0x8] sm:$0xff] %vm40_vm0, %v39_v12  ;;  %v595_v14 = vld [vmem:[#allocation3 + $0xac] ss:$12 sps:$4 sm:$0xff]   ;;  %v590_v15 = vld [vmem:[#allocation3 + $0x30] ss:$12 sps:$4 sm:$0xff]  }
  0x13   :  { %497 = vmatpush3.bf16.msra.mxu0 %v582_v4  ;;  %38 = vst.msk [vmem:[#allocation2] sm:$0xff] %vm37_vm1, %v36_v13  ;;  %535 = vmatpush3.bf16.msra.mxu1 %v595_v14  ;;  %v596_v16 = vld [vmem:[#allocation3 + $0x94] ss:$12 sps:$4 sm:$0xff]   ;;  %v591_v17 = vld [vmem:[#allocation3 + $0xd8] ss:$12 sps:$4 sm:$0xff]   ;;  %vm637_vm2 = vmmov 0  }
  0x14   :  { %498 = vmatprep.subr.bf16.mxu0 %v583_v5  ;;  %536 = vmatprep.subr.bf16.mxu1 %v636_v0  ;;  %v592_v18 = vld [vmem:[#allocation3 + $0x18] ss:$12 sps:$4 sm:$0xff]   ;;  %v593_v19 = vld [vmem:[#allocation3 + $0xc0] ss:$12 sps:$4 sm:$0xff]   ;;  %v597_v21 = vld [vmem:[#allocation3 + $0x7c] ss:$12 sps:$4 sm:$0xff]  }
  0x15   :  { %v594_v22 = vld [vmem:[#allocation3] ss:$12 sps:$4 sm:$0xff]   ;;  %v598_v25 = vld [vmem:[#allocation3 + $0x64] ss:$12 sps:$4 sm:$0xff]   ;;  %v601_v29 = vld [vmem:[#allocation3 + $0x1c] ss:$12 sps:$4 sm:$0xff]   ;;  %550 = vmatprep.mubr.msk.bf16.mxu1 %vm637_vm2, %v636_v0 }
  0x16   :  { %v599_v27 = vld [vmem:[#allocation3 + $0x4c] ss:$12 sps:$4 sm:$0xff]   ;;  %v600_v28 = vld [vmem:[#allocation3 + $0x34] ss:$12 sps:$4 sm:$0xff]   ;;  %v602_v30 = vld [vmem:[#allocation3 + $0x4] ss:$12 sps:$4 sm:$0xff]  }
  0x17   :  { %499 = vmatpush3.bf16.msra.mxu0 %v584_v6  ;;  %537 = vmatpush3.bf16.msra.mxu1 %v596_v16  ;;  %v603_v31 = vld [vmem:[#allocation3 + $0xb0] ss:$12 sps:$4 sm:$0xff]   ;;  %v604_v32 = vld [vmem:[#allocation3 + $0x98] ss:$12 sps:$4 sm:$0xff]   ;;  %v605_v33 = vld [vmem:[#allocation3 + $0x80] ss:$12 sps:$4 sm:$0xff]  }
  0x18   :  { %500 = vmatprep.subr.bf16.mxu0 %v585_v7  ;;  %538 = vmatprep.subr.bf16.mxu1 %v636_v0  ;;  %v606_v34 = vld [vmem:[#allocation3 + $0x68] ss:$12 sps:$4 sm:$0xff]   ;;  %v607_v35 = vld [vmem:[#allocation3 + $0x50] ss:$12 sps:$4 sm:$0xff]   ;;  %v459_v39 = vld [vmem:[%s711_s3] ss:$0 sm:$0xff] }
  0x19   :  { %v43_v20 = vld [vmem:[#allocation2 + $0x8] sm:$0xff]  ;;  %v608_v48 = vld [vmem:[#allocation3 + $0x38] ss:$12 sps:$4 sm:$0xff]   ;;  %v476_v51 = vld [vmem:[%s711_s3 + $0x1] ss:$0 sm:$0xff] }
  0x1a   :  { %v47_v23 = vpack.c.bf16 %v636_v0, %v43_v20  ;;  %v42_v24 = vld [vmem:[#allocation2] sm:$0xff]  ;;  %v610_v50 = vld [vmem:[#allocation3 + $0x8] ss:$12 sps:$4 sm:$0xff]  }
  0x1b   :  { %501 = vmatpush3.bf16.msra.mxu0 %v586_v8  ;;  %539 = vmatpush3.bf16.msra.mxu1 %v597_v21  ;;  %v46_v26 = vpack.c.bf16 %v636_v0, %v42_v24  ;;  %v609_v49 = vld [vmem:[#allocation3 + $0x20] ss:$12 sps:$4 sm:$0xff]  }
  0x1c   :  { %502 = vmatprep.subr.bf16.mxu0 %v587_v9  ;;  %215 = vmatprep.mubr.bf16.mxu0 %v47_v23  ;;  %v485_v61 = vld [vmem:[%s711_s3 + $0x2] ss:$0 sm:$0xff] }
  0x1d   :  { %540 = vmatprep.subr.bf16.mxu1 %v636_v0 }
  0x1f   :  { %503 = vmatpush3.bf16.msra.mxu0 %v588_v10  ;;  %541 = vmatpush3.bf16.msra.mxu1 %v598_v25 }
  0x20   :  { %504 = vmatprep.subr.bf16.mxu0 %v589_v11  ;;  %542 = vmatprep.subr.bf16.mxu1 %v636_v0 }
  0x23   :  { %505 = vmatpush3.bf16.msra.mxu0 %v590_v15  ;;  %543 = vmatpush3.bf16.msra.mxu1 %v599_v27 }
  0x24   :  { %506 = vmatprep.subr.bf16.mxu0 %v591_v17  ;;  %544 = vmatprep.subr.bf16.mxu1 %v636_v0 }
  0x27   :  { %507 = vmatpush3.bf16.msra.mxu0 %v592_v18  ;;  %545 = vmatpush3.bf16.msra.mxu1 %v600_v28 }
  0x28   :  { %508 = vmatprep.subr.bf16.mxu0 %v593_v19  ;;  %546 = vmatprep.subr.bf16.mxu1 %v636_v0 }
  0x2b   :  { %509 = vmatpush3.bf16.msra.mxu0 %v594_v22  ;;  %547 = vmatpush3.bf16.msra.mxu1 %v601_v29 }
  0x2c   :  { %554 = vmatprep.subr.bf16.mxu0 %v636_v0  ;;  %548 = vmatprep.subr.bf16.mxu1 %v636_v0 }
  0x2e   :  { %216 = vmatmul.mubr.bf16.vlgmr.msra.gmra.mxu0 %v46_v26 }
  0x2f   :  { %549 = vmatpush3.bf16.msra.mxu1 %v602_v30  ;;  %570 = vmatprep.mubr.msk.bf16.mxu0 %vm637_vm2, %v636_v0 }
  0x30   :  { %555 = vmatpush3.bf16.msra.mxu0 %v603_v31 }
  0x31   :  { %556 = vmatprep.subr.bf16.mxu0 %v636_v0 }
  0x34   :  { %557 = vmatpush3.bf16.msra.mxu0 %v604_v32 }
  0x35   :  { %558 = vmatprep.subr.bf16.mxu0 %v636_v0 }
  0x38   :  { %559 = vmatpush3.bf16.msra.mxu0 %v605_v33 }
  0x39   :  { %560 = vmatprep.subr.bf16.mxu0 %v636_v0 }
  0x3c   :  { %561 = vmatpush3.bf16.msra.mxu0 %v606_v34 }
  0x3d   :  { %562 = vmatprep.subr.bf16.mxu0 %v636_v0 }
  0x40   :  { %563 = vmatpush3.bf16.msra.mxu0 %v607_v35 }
  0x41   :  { %564 = vmatprep.subr.bf16.mxu0 %v636_v0 }
  0x44   :  { %565 = vmatpush3.bf16.msra.mxu0 %v608_v48 }
  0x45   :  { %566 = vmatprep.subr.bf16.mxu0 %v636_v0 }
  0x48   :  { %567 = vmatpush3.bf16.msra.mxu0 %v609_v49 }
  0x49   :  { %568 = vmatprep.subr.bf16.mxu0 %v636_v0 }
  0x4c   :  { %569 = vmatpush3.bf16.msra.mxu0 %v610_v50 }
  0xee   :  { %v510_v36 = vpop.f32.mrf.mxu0 }
  0xf0   :  { %v511_v37 = vpop.f32.mrf.mxu0 }
  0xf1   :  { %v512_v38 = vadd.f32 %v511_v37, %v510_v36 }
  0xf2   :  { %v513_v40 = vpop.f32.mrf.mxu0 }
  0xf3   :  { %v218_v42 = vadd.f32 %v512_v38, %v459_v39 }
  0xf4   :  { %v514_v41 = vpop.f32.mrf.mxu0 }
  0xf5   :  { %v515_v43 = vadd.f32 %v514_v41, %v513_v40  ;;  %v224_v45 = vmax.f32 %v218_v42, 0.0 }
  0xf7   :  { %v221_v44 = vadd.f32 %v515_v43, %v459_v39 }
  0xf9   :  { %v225_v46 = vmax.f32 %v221_v44, 0.0 }
  0xfb   :  { %v226_v47 = vpack.c.bf16 %v225_v46, %v224_v45 }
  0xfd   :  { %551 = vmatmul.mubr.bf16.vlgmr.msra.gmra.mxu1 %v226_v47 }
 0x1bd   :  { %v332_v52 = vpop.f32.mrf.mxu1 }
 0x1be   :  { %v333_v54 = vadd.f32 %v476_v51, %v332_v52 }
 0x1bf   :  { %v552_v53 = vpop.f32.mrf.mxu1 }
 0x1c0   :  { %v339_v58 = vmax.f32 %v333_v54, 0.0 }
 0x1c1   :  { %v335_v55 = vpop.f32.mrf.mxu1 }
 0x1c2   :  { %v336_v56 = vadd.f32 %v476_v51, %v335_v55 }
 0x1c3   :  { %v553_v57 = vpop.f32.mrf.mxu1 }
 0x1c4   :  { %v340_v59 = vmax.f32 %v336_v56, 0.0 }
 0x1c6   :  { %v341_v60 = vpack.c.bf16 %v340_v59, %v339_v58 }
 0x1c8   :  { %571 = vmatmul.mubr.bf16.vlgmr.msra.gmra.mxu0 %v341_v60 }
 0x288   :  { %v447_v62 = vpop.f32.mrf.mxu0 }
 0x289   :  { %v448_v63 = vadd.f32 %v485_v61, %v447_v62 }
 0x28a   :  { %v572_v0 = vpop.f32.mrf.mxu0 }
 0x28b   :  { %453 = vst.msk [vmem:[%s712_s4] sm:$0xff] %vm40_vm0, %v448_v63 }
 0x28c   :  { %v450_v1 = vpop.f32.mrf.mxu0 }
 0x28e   :  { %v573_v2 = vpop.f32.mrf.mxu0 }
 0x28f   :  { %458 = vsyncpa [#allocation4], 1 }

</bundles_post_ra>
